<compile_context>
chip_gen: v6e
topology: v6e:2x2x1
jax: 0.10.0
libtpu: 0.0.40
codegen_flags: <defaults>
</compile_context>

<pallas_src>
import functools

import jax
import jax.numpy as jnp
from jax.experimental import pallas as pl
from jax.experimental.pallas import tpu as pltpu


def _round_up(v, m):
    return (v + m - 1) // m * m


def _vmem_capacity_bytes():
    try:
        return int(pltpu.get_tpu_info().vmem_capacity_bytes)
    except Exception:
        return 64 << 20  # conservative default (v7x per-TensorCore VMEM)


def _vmem_bytes(c, cip, t):
    """Conservative per-grid-step VMEM high-water estimate (bytes) for a (c, t) tile."""
    io = 4 * c * t * 4                      # x + out blocks, double-buffered
    tmp = (c * t * 2                        # x_bf
           + cip * t * 4                    # h (f32 accumulate)
           + cip * t * 2                    # h (bf16 for second matmul)
           + 2 * c * t * 4)                 # xl / z, wei (f32)
    consts = 2 * (4 * cip * c * 4 + 4 * (cip + c) * 4)   # weights + biases, double-buffered
    return io + tmp + consts + (2 << 20)    # + headroom


# ----------------------------- kernels -----------------------------

def _ms_cam_fused_kernel(inv_hw, x_ref, w1t_ref, b1_ref, w2t_ref, b2_ref,
                         w1gt_ref, b1g_ref, w2gt_ref, b2g_ref, out_ref):
    """One grid step = one full (C, HW_pad) image of one batch element.

    x is read from HBM exactly once; the global-branch mean + tiny MLP run here.
    Padded spatial lanes are zero, so the channel sum is exact (divide by true HW).
    """
    x = x_ref[0]                                         # (C, HWp) f32
    x_bf = x.astype(jnp.bfloat16)

    # ---- global branch (tiny, f32): mean -> 1x1 MLP -> xg (C, 1) ----
    xmean = jnp.sum(x, axis=1, keepdims=True) * inv_hw               # (C, 1)
    hg = jnp.maximum(
        jnp.dot(w1gt_ref[...], xmean, preferred_element_type=jnp.float32)
        + b1g_ref[...], 0.0)                                          # (Cip, 1)
    xg = jnp.dot(w2gt_ref[...], hg,
                 preferred_element_type=jnp.float32) + b2g_ref[...]   # (C, 1)

    # ---- local branch: 1x1 conv -> BN -> ReLU -> 1x1 conv -> BN (BN folded) ----
    h = jnp.dot(w1t_ref[...], x_bf,
                preferred_element_type=jnp.float32) + b1_ref[...]     # (Cip, HWp)
    h = jnp.maximum(h, 0.0)
    xl = jnp.dot(w2t_ref[...], h.astype(jnp.bfloat16),
                 preferred_element_type=jnp.float32)                  # (C, HWp), no bias yet

    # fold conv-2 bias with the global branch -> one broadcast add per tile
    z = xl + (b2_ref[...] + xg)
    # sigmoid via a single tanh (one EUP op / element instead of exp + reciprocal)
    wei = 0.5 * jnp.tanh(0.5 * z) + 0.5
    out_ref[0] = x * wei


def _ms_cam_tiled_kernel(x_ref, bxg_ref, w1t_ref, b1_ref, w2t_ref, out_ref):
    """Fallback: one (C, T_HW) spatial tile; (b2 + xg) precomputed in the wrapper."""
    x = x_ref[0]                                         # (C, T) f32
    x_bf = x.astype(jnp.bfloat16)
    h = jnp.dot(w1t_ref[...], x_bf,
                preferred_element_type=jnp.float32) + b1_ref[...]
    h = jnp.maximum(h, 0.0)
    xl = jnp.dot(w2t_ref[...], h.astype(jnp.bfloat16),
                 preferred_element_type=jnp.float32)
    z = xl + bxg_ref[0]                                  # (C, 1) = b2 + xg, folded
    wei = 0.5 * jnp.tanh(0.5 * z) + 0.5
    out_ref[0] = x * wei


# ----------------------------- wrapper -----------------------------

def _fold_conv_bn(w, b_conv, gamma, beta, mean, var, eps=1e-5):
    """Fold eval-mode BatchNorm into a (Cin, Cout) matmul weight + bias."""
    s = gamma / jnp.sqrt(var + eps)
    w_f = (w * s[None, :]).astype(jnp.float32)
    b_f = ((b_conv - mean) * s + beta).astype(jnp.float32)
    return w_f, b_f


@functools.partial(jax.jit, static_argnames=("tile_hw",))
def ms_cam_forward(x_nchw, params, tile_hw=None):
    """x_nchw: (N, C, H, W) float32.  Returns (N, C, H, W)."""
    N, C, H, W = x_nchw.shape
    HW = H * W
    Ci = params["w1"].shape[1]
    Cip = max(8, _round_up(Ci, 8))            # sublane-align only (no 128 padding)

    capacity = _vmem_capacity_bytes()
    budget = int(capacity * 0.6)              # tile-selection budget (keeps v7x headroom)

    # NCHW -> (N, C, HW): free reshape, no transpose; HW on the lane axis.
    x = x_nchw.reshape(N, C, HW).astype(jnp.float32)

    # ---- fold BN into the 1x1-conv weights / biases (eval-mode, exact) ----
    w1, b1 = _fold_conv_bn(params["w1"], params["b1_conv"], params["bn1_g"],
                           params["bn1_b"], params["bn1_m"], params["bn1_v"])
    w2, b2 = _fold_conv_bn(params["w2"], params["b2_conv"], params["bn2_g"],
                           params["bn2_b"], params["bn2_m"], params["bn2_v"])
    w1g, b1g = _fold_conv_bn(params["w1g"], params["b1g_conv"], params["bn1g_g"],
                             params["bn1g_b"], params["bn1g_m"], params["bn1g_v"])
    w2g, b2g = _fold_conv_bn(params["w2g"], params["b2g_conv"], params["bn2g_g"],
                             params["bn2g_b"], params["bn2g_m"], params["bn2g_v"])

    # ---- zero-pad Ci -> Cip (exact: padded h rows are relu(0)=0, matching w2 rows 0) ----
    w1p = jnp.zeros((C, Cip), jnp.float32).at[:, :Ci].set(w1)
    b1p = jnp.zeros((Cip,), jnp.float32).at[:Ci].set(b1)
    w2p = jnp.zeros((Cip, C), jnp.float32).at[:Ci, :].set(w2)
    w1gp = jnp.zeros((C, Cip), jnp.float32).at[:, :Ci].set(w1g)
    b1gp = jnp.zeros((Cip,), jnp.float32).at[:Ci].set(b1g)
    w2gp = jnp.zeros((Cip, C), jnp.float32).at[:Ci, :].set(w2g)

    # Transposed for the (C, HW) data layout; bf16 MXU operands, f32 biases.
    w1t = w1p.T.astype(jnp.bfloat16)          # (Cip, C)
    w2t = w2p.T.astype(jnp.bfloat16)          # (C, Cip)
    b1c = b1p.reshape(Cip, 1)
    b2c = b2.reshape(C, 1)

    hw128 = _round_up(HW, 128)
    use_fused = (tile_hw is None) and (_vmem_bytes(C, Cip, hw128) <= budget)

    if use_fused:
        # ---- primary path: single HBM read, in-kernel global branch, grid=(N,) ----
        # (mem-bound; on v7x both TCs are fed whenever N >= 2)
        w1gt = w1gp.T                          # (Cip, C) f32
        w2gt = w2gp.T                          # (C, Cip) f32
        b1gc = b1gp.reshape(Cip, 1)
        b2gc = b2g.reshape(C, 1)

        hw_pad = hw128
        xp = x if hw_pad == HW else jnp.pad(x, ((0, 0), (0, 0), (0, hw_pad - HW)))
        est = _vmem_bytes(C, Cip, hw_pad)
        vmem_limit = int(min(0.85 * capacity, max(32 << 20, est + (4 << 20))))

        const = lambda shape: pl.BlockSpec(shape, lambda n: (0,) * len(shape))

        out = pl.pallas_call(
            functools.partial(_ms_cam_fused_kernel, float(1.0 / HW)),
            out_shape=jax.ShapeDtypeStruct((N, C, hw_pad), jnp.float32),
            grid=(N,),
            in_specs=[
                pl.BlockSpec((1, C, hw_pad), lambda n: (n, 0, 0)),   # x (full image)
                const((Cip, C)), const((Cip, 1)),                    # local layer 1 (folded)
                const((C, Cip)), const((C, 1)),                      # local layer 2 (folded)
                const((Cip, C)), const((Cip, 1)),                    # global layer 1 (folded)
                const((C, Cip)), const((C, 1)),                      # global layer 2 (folded)
            ],
            out_specs=pl.BlockSpec((1, C, hw_pad), lambda n: (n, 0, 0)),
            compiler_params=pltpu.CompilerParams(
                dimension_semantics=("parallel",),
                vmem_limit_bytes=vmem_limit),
        )(xp, w1t, b1c, w2t, b2c, w1gt, b1gc, w2gt, b2gc)

    else:
        # ---- fallback path (large HW): spatial tiling, global branch precomputed ----
        # TODO(synk): this path still reads x twice (wrapper mean + kernel); a
        #             resident two-pass scheme could remove the extra read.
        mean = jnp.mean(x, axis=2)                              # (N, C), true HW
        hg = jnp.maximum(mean @ w1g + b1g[None, :], 0.0)        # (N, Ci)
        xg = hg @ w2g + b2g[None, :]                            # (N, C)
        bxg = (xg + b2[None, :]).reshape(N, C, 1)               # b2 + xg folded

        if tile_hw is not None:
            assert tile_hw % 128 == 0, "tile_hw must be a multiple of 128"
            t = int(tile_hw)
        else:
            fixed = _vmem_bytes(C, Cip, 0)
            per_lane = _vmem_bytes(C, Cip, 1) - fixed
            t = max(128, (budget - fixed) // max(1, per_lane) // 128 * 128)
            t = int(min(t, hw128))
        hw_pad = _round_up(HW, t)
        xp = x if hw_pad == HW else jnp.pad(x, ((0, 0), (0, 0), (0, hw_pad - HW)))
        grid = (N, hw_pad // t)
        est = _vmem_bytes(C, Cip, t)
        vmem_limit = int(min(0.85 * capacity, max(32 << 20, est + (4 << 20))))

        const2 = lambda shape: pl.BlockSpec(shape, lambda n, j: (0,) * len(shape))

        out = pl.pallas_call(
            _ms_cam_tiled_kernel,
            out_shape=jax.ShapeDtypeStruct((N, C, hw_pad), jnp.float32),
            grid=grid,
            in_specs=[
                pl.BlockSpec((1, C, t), lambda n, j: (n, 0, j)),     # x spatial tile
                pl.BlockSpec((1, C, 1), lambda n, j: (n, 0, 0)),     # b2 + xg
                const2((Cip, C)), const2((Cip, 1)), const2((C, Cip)),
            ],
            out_specs=pl.BlockSpec((1, C, t), lambda n, j: (n, 0, j)),
            compiler_params=pltpu.CompilerParams(
                dimension_semantics=("parallel", "parallel"),
                vmem_limit_bytes=vmem_limit),
        )(xp, bxg, w1t, b1c, w2t)

    if hw_pad != HW:
        out = out[:, :, :HW]
    return out.reshape(N, C, H, W)


# ----------------------------- reference + test -----------------------------

def _reference(x_nchw, params, eps=1e-5):
    """Plain-JAX reference implementing the PyTorch module (eval-mode BN), f32."""
    x = jnp.transpose(x_nchw, (0, 2, 3, 1))        # NHWC

    def bn(y, g, b, m, v):
        return (y - m) / jnp.sqrt(v + eps) * g + b

    def branch(inp, p):
        h = jnp.einsum("...c,ci->...i", inp, p["w1"]) + p["b1_conv"]
        h = bn(h, p["bn1_g"], p["bn1_b"], p["bn1_m"], p["bn1_v"])
        h = jnp.maximum(h, 0.0)
        o = jnp.einsum("...i,ic->...c", h, p["w2"]) + p["b2_conv"]
        return bn(o, p["bn2_g"], p["bn2_b"], p["bn2_m"], p["bn2_v"])

    local_p = {k: params[k] for k in
               ["w1", "b1_conv", "bn1_g", "bn1_b", "bn1_m", "bn1_v",
                "w2", "b2_conv", "bn2_g", "bn2_b", "bn2_m", "bn2_v"]}
    global_p = {"w1": params["w1g"], "b1_conv": params["b1g_conv"],
                "bn1_g": params["bn1g_g"], "bn1_b": params["bn1g_b"],
                "bn1_m": params["bn1g_m"], "bn1_v": params["bn1g_v"],
                "w2": params["w2g"], "b2_conv": params["b2g_conv"],
                "bn2_g": params["bn2g_g"], "bn2_b": params["bn2g_b"],
                "bn2_m": params["bn2g_m"], "bn2_v": params["bn2g_v"]}

    xl = branch(x, local_p)                                          # (N,H,W,C)
    xg = branch(jnp.mean(x, axis=(1, 2), keepdims=True), global_p)   # (N,1,1,C)
    wei = jax.nn.sigmoid(xl + xg)
    return jnp.transpose(x * wei, (0, 3, 1, 2))


def _make_params(key, C, r):
    Ci = C // r
    ks = jax.random.split(key, 12)
    p = {}
    # 1x1 conv weights stored as (Cin, Cout) matmul weights
    p["w1"] = jax.random.normal(ks[0], (C, Ci), jnp.float32) * 0.1
    p["b1_conv"] = jax.random.normal(ks[1], (Ci,), jnp.float32) * 0.1
    p["w2"] = jax.random.normal(ks[2], (Ci, C), jnp.float32) * 0.1
    p["b2_conv"] = jax.random.normal(ks[3], (C,), jnp.float32) * 0.1
    p["w1g"] = jax.random.normal(ks[4], (C, Ci), jnp.float32) * 0.1
    p["b1g_conv"] = jax.random.normal(ks[5], (Ci,), jnp.float32) * 0.1
    p["w2g"] = jax.random.normal(ks[6], (Ci, C), jnp.float32) * 0.1
    p["b2g_conv"] = jax.random.normal(ks[7], (C,), jnp.float32) * 0.1

    def bn_params(k, n, prefix):
        k1, k2, k3, k4 = jax.random.split(k, 4)
        p[prefix + "_g"] = 1.0 + 0.1 * jax.random.normal(k1, (n,), jnp.float32)
        p[prefix + "_b"] = 0.1 * jax.random.normal(k2, (n,), jnp.float32)
        p[prefix + "_m"] = 0.1 * jax.random.normal(k3, (n,), jnp.float32)
        p[prefix + "_v"] = 1.0 + 0.1 * jax.nn.softplus(jax.random.normal(k4, (n,), jnp.float32))

    bn_params(ks[8], Ci, "bn1")
    bn_params(ks[9], C, "bn2")
    bn_params(ks[10], Ci, "bn1g")
    bn_params(ks[11], C, "bn2g")
    return p


if __name__ == "__main__":
    # Module defaults: channels=64, r=4 (inter=16); small spatial 16x16, batch 2.
    N, C, H, W, r = 2, 64, 16, 16, 4
    key = jax.random.PRNGKey(0)
    k_x, k_p = jax.random.split(key)
    x = jax.random.normal(k_x, (N, C, H, W), jnp.float32)
    params = _make_params(k_p, C, r)
    ref = _reference(x, params)

    # Primary (fused, single-HBM-read) path: grid = (2,), full-HW blocks.
    out_fused = jax.block_until_ready(ms_cam_forward(x, params))
    # Fallback (tiled, large-image) path exercised at small shape: grid = (2, 2).
    out_tiled = jax.block_until_ready(ms_cam_forward(x, params, tile_hw=128))

    for out in (out_fused, out_tiled):
        assert out.shape == (N, C, H, W)
        # bf16 MXU matmuls in the local branch -> modest tolerance.
        err = float(jnp.max(jnp.abs(out - ref)))
        assert err < 5e-2, f"mismatch vs JAX reference (max abs err {err})"

    print("KERNEL_OK")
</pallas_src>

<mosaic_0001>
module attributes {stable_mosaic.version = 11 : i64} {
  func.func @_ms_cam_fused_kernel(%arg0: i32, %arg1: memref<1x64x256xf32, #tpu.memory_space<vmem>>, %arg2: memref<16x64xbf16, #tpu.memory_space<vmem>>, %arg3: memref<16x1xf32, #tpu.memory_space<vmem>>, %arg4: memref<64x16xbf16, #tpu.memory_space<vmem>>, %arg5: memref<64x1xf32, #tpu.memory_space<vmem>>, %arg6: memref<16x64xf32, #tpu.memory_space<vmem>>, %arg7: memref<16x1xf32, #tpu.memory_space<vmem>>, %arg8: memref<64x16xf32, #tpu.memory_space<vmem>>, %arg9: memref<64x1xf32, #tpu.memory_space<vmem>>, %arg10: memref<1x64x256xf32, #tpu.memory_space<vmem>>) attributes {dimension_semantics = [#tpu.dimension_semantics<parallel>], iteration_bounds = array<i64: 2>, scalar_prefetch = 0 : i64, scratch_operands = 0 : i64, tpu.core_type = #tpu.core_type<tc>, window_params = [{transform_indices = @transform_0, window_bounds = array<i64: 1, 64, 256>}, {pipeline_mode = #tpu.pipeline_mode<synchronous>, transform_indices = @transform_1, window_bounds = array<i64: 16, 64>}, {pipeline_mode = #tpu.pipeline_mode<synchronous>, transform_indices = @transform_2, window_bounds = array<i64: 16, 1>}, {pipeline_mode = #tpu.pipeline_mode<synchronous>, transform_indices = @transform_3, window_bounds = array<i64: 64, 16>}, {pipeline_mode = #tpu.pipeline_mode<synchronous>, transform_indices = @transform_4, window_bounds = array<i64: 64, 1>}, {pipeline_mode = #tpu.pipeline_mode<synchronous>, transform_indices = @transform_5, window_bounds = array<i64: 16, 64>}, {pipeline_mode = #tpu.pipeline_mode<synchronous>, transform_indices = @transform_6, window_bounds = array<i64: 16, 1>}, {pipeline_mode = #tpu.pipeline_mode<synchronous>, transform_indices = @transform_7, window_bounds = array<i64: 64, 16>}, {pipeline_mode = #tpu.pipeline_mode<synchronous>, transform_indices = @transform_8, window_bounds = array<i64: 64, 1>}, {transform_indices = @transform_9, window_bounds = array<i64: 1, 64, 256>}]} {
    %c0 = arith.constant 0 : index
    %c0_0 = arith.constant 0 : index
    %c0_1 = arith.constant 0 : index
    %0 = vector.load %arg1[%c0, %c0_0, %c0_1] : memref<1x64x256xf32, #tpu.memory_space<vmem>>, vector<1x64x256xf32>
    %1 = vector.shape_cast %0 : vector<1x64x256xf32> to vector<64x256xf32>
    %2 = arith.truncf %1 : vector<64x256xf32> to vector<64x256xbf16>
    %cst = arith.constant dense<0.000000e+00> : vector<64xf32>
    %3 = vector.multi_reduction <add>, %1, %cst [1] : vector<64x256xf32> to vector<64xf32>
    %4 = vector.shape_cast %3 : vector<64xf32> to vector<64x1xf32>
    %cst_2 = arith.constant 3.906250e-03 : f32
    %5 = vector.broadcast %cst_2 : f32 to vector<64x1xf32>
    %6 = arith.mulf %4, %5 : vector<64x1xf32>
    %c0_3 = arith.constant 0 : index
    %c0_4 = arith.constant 0 : index
    %7 = vector.load %arg6[%c0_3, %c0_4] : memref<16x64xf32, #tpu.memory_space<vmem>>, vector<16x64xf32>
    %cst_5 = arith.constant dense<0.000000e+00> : vector<16x1xf32>
    %8 = tpu.matmul %7, %6, %cst_5 {dimension_numbers = #tpu.dot_dimension_numbers<[1], [0], [0], [1], [0, 0, 1, 1], [], []>} : vector<16x64xf32>, vector<64x1xf32>, vector<16x1xf32> -> vector<16x1xf32>
    %c0_6 = arith.constant 0 : index
    %c0_7 = arith.constant 0 : index
    %9 = vector.load %arg7[%c0_6, %c0_7] : memref<16x1xf32, #tpu.memory_space<vmem>>, vector<16x1xf32>
    %10 = arith.addf %8, %9 : vector<16x1xf32>
    %cst_8 = arith.constant 0.000000e+00 : f32
    %11 = vector.broadcast %cst_8 : f32 to vector<16x1xf32>
    %12 = arith.maximumf %10, %11 : vector<16x1xf32>
    %c0_9 = arith.constant 0 : index
    %c0_10 = arith.constant 0 : index
    %13 = vector.load %arg8[%c0_9, %c0_10] : memref<64x16xf32, #tpu.memory_space<vmem>>, vector<64x16xf32>
    %cst_11 = arith.constant dense<0.000000e+00> : vector<64x1xf32>
    %14 = tpu.matmul %13, %12, %cst_11 {dimension_numbers = #tpu.dot_dimension_numbers<[1], [0], [0], [1], [0, 0, 1, 1], [], []>} : vector<64x16xf32>, vector<16x1xf32>, vector<64x1xf32> -> vector<64x1xf32>
    %c0_12 = arith.constant 0 : index
    %c0_13 = arith.constant 0 : index
    %15 = vector.load %arg9[%c0_12, %c0_13] : memref<64x1xf32, #tpu.memory_space<vmem>>, vector<64x1xf32>
    %16 = arith.addf %14, %15 : vector<64x1xf32>
    %c0_14 = arith.constant 0 : index
    %c0_15 = arith.constant 0 : index
    %17 = vector.load %arg2[%c0_14, %c0_15] : memref<16x64xbf16, #tpu.memory_space<vmem>>, vector<16x64xbf16>
    %cst_16 = arith.constant dense<0.000000e+00> : vector<16x256xf32>
    %18 = tpu.matmul %17, %2, %cst_16 {dimension_numbers = #tpu.dot_dimension_numbers<[1], [0], [0], [1], [0, 0, 1, 1], [], []>} : vector<16x64xbf16>, vector<64x256xbf16>, vector<16x256xf32> -> vector<16x256xf32>
    %c0_17 = arith.constant 0 : index
    %c0_18 = arith.constant 0 : index
    %19 = vector.load %arg3[%c0_17, %c0_18] : memref<16x1xf32, #tpu.memory_space<vmem>>, vector<16x1xf32>
    %20 = vector.broadcast %19 : vector<16x1xf32> to vector<16x256xf32>
    %21 = arith.addf %18, %20 : vector<16x256xf32>
    %cst_19 = arith.constant 0.000000e+00 : f32
    %22 = vector.broadcast %cst_19 : f32 to vector<16x256xf32>
    %23 = arith.maximumf %21, %22 : vector<16x256xf32>
    %c0_20 = arith.constant 0 : index
    %c0_21 = arith.constant 0 : index
    %24 = vector.load %arg4[%c0_20, %c0_21] : memref<64x16xbf16, #tpu.memory_space<vmem>>, vector<64x16xbf16>
    %25 = arith.truncf %23 : vector<16x256xf32> to vector<16x256xbf16>
    %cst_22 = arith.constant dense<0.000000e+00> : vector<64x256xf32>
    %26 = tpu.matmul %24, %25, %cst_22 {dimension_numbers = #tpu.dot_dimension_numbers<[1], [0], [0], [1], [0, 0, 1, 1], [], []>} : vector<64x16xbf16>, vector<16x256xbf16>, vector<64x256xf32> -> vector<64x256xf32>
    %c0_23 = arith.constant 0 : index
    %c0_24 = arith.constant 0 : index
    %27 = vector.load %arg5[%c0_23, %c0_24] : memref<64x1xf32, #tpu.memory_space<vmem>>, vector<64x1xf32>
    %28 = arith.addf %27, %16 : vector<64x1xf32>
    %29 = vector.broadcast %28 : vector<64x1xf32> to vector<64x256xf32>
    %30 = arith.addf %26, %29 : vector<64x256xf32>
    %cst_25 = arith.constant 5.000000e-01 : f32
    %31 = vector.broadcast %cst_25 : f32 to vector<64x256xf32>
    %32 = arith.mulf %31, %30 : vector<64x256xf32>
    %33 = math.tanh %32 : vector<64x256xf32>
    %cst_26 = arith.constant 5.000000e-01 : f32
    %34 = vector.broadcast %cst_26 : f32 to vector<64x256xf32>
    %35 = arith.mulf %34, %33 : vector<64x256xf32>
    %cst_27 = arith.constant 5.000000e-01 : f32
    %36 = vector.broadcast %cst_27 : f32 to vector<64x256xf32>
    %37 = arith.addf %35, %36 : vector<64x256xf32>
    %38 = arith.mulf %1, %37 : vector<64x256xf32>
    %c0_28 = arith.constant 0 : index
    %c0_29 = arith.constant 0 : index
    %c0_30 = arith.constant 0 : index
    %39 = vector.load %arg10[%c0_28, %c0_29, %c0_30] : memref<1x64x256xf32, #tpu.memory_space<vmem>>, vector<1x64x256xf32>
    %40 = vector.shape_cast %39 : vector<1x64x256xf32> to vector<64x256xf32>
    %41 = vector.shape_cast %38 : vector<64x256xf32> to vector<1x64x256xf32>
    tpu.vector_store %arg10[%c0_28, %c0_29, %c0_30], %41 {strides = array<i32>} : memref<1x64x256xf32, #tpu.memory_space<vmem>>, vector<1x64x256xf32>,
    return
  }
  func.func @transform_0(%arg0: i32) -> (i32, i32, i32) {
    %c0_i32 = arith.constant 0 : i32
    %c0_i32_0 = arith.constant 0 : i32
    %c0_i32_1 = arith.constant 0 : i32
    return %arg0, %c0_i32, %c0_i32_0 : i32, i32, i32
  }
  func.func @transform_1(%arg0: i32) -> (i32, i32) {
    %c0_i32 = arith.constant 0 : i32
    %c0_i32_0 = arith.constant 0 : i32
    %c0_i32_1 = arith.constant 0 : i32
    return %c0_i32, %c0_i32_0 : i32, i32
  }
  func.func @transform_2(%arg0: i32) -> (i32, i32) {
    %c0_i32 = arith.constant 0 : i32
    %c0_i32_0 = arith.constant 0 : i32
    %c0_i32_1 = arith.constant 0 : i32
    return %c0_i32, %c0_i32_0 : i32, i32
  }
  func.func @transform_3(%arg0: i32) -> (i32, i32) {
    %c0_i32 = arith.constant 0 : i32
    %c0_i32_0 = arith.constant 0 : i32
    %c0_i32_1 = arith.constant 0 : i32
    return %c0_i32, %c0_i32_0 : i32, i32
  }
  func.func @transform_4(%arg0: i32) -> (i32, i32) {
    %c0_i32 = arith.constant 0 : i32
    %c0_i32_0 = arith.constant 0 : i32
    %c0_i32_1 = arith.constant 0 : i32
    return %c0_i32, %c0_i32_0 : i32, i32
  }
  func.func @transform_5(%arg0: i32) -> (i32, i32) {
    %c0_i32 = arith.constant 0 : i32
    %c0_i32_0 = arith.constant 0 : i32
    %c0_i32_1 = arith.constant 0 : i32
    return %c0_i32, %c0_i32_0 : i32, i32
  }
  func.func @transform_6(%arg0: i32) -> (i32, i32) {
    %c0_i32 = arith.constant 0 : i32
    %c0_i32_0 = arith.constant 0 : i32
    %c0_i32_1 = arith.constant 0 : i32
    return %c0_i32, %c0_i32_0 : i32, i32
  }
  func.func @transform_7(%arg0: i32) -> (i32, i32) {
    %c0_i32 = arith.constant 0 : i32
    %c0_i32_0 = arith.constant 0 : i32
    %c0_i32_1 = arith.constant 0 : i32
    return %c0_i32, %c0_i32_0 : i32, i32
  }
  func.func @transform_8(%arg0: i32) -> (i32, i32) {
    %c0_i32 = arith.constant 0 : i32
    %c0_i32_0 = arith.constant 0 : i32
    %c0_i32_1 = arith.constant 0 : i32
    return %c0_i32, %c0_i32_0 : i32, i32
  }
  func.func @transform_9(%arg0: i32) -> (i32, i32, i32) {
    %c0_i32 = arith.constant 0 : i32
    %c0_i32_0 = arith.constant 0 : i32
    %c0_i32_1 = arith.constant 0 : i32
    return %arg0, %c0_i32, %c0_i32_0 : i32, i32, i32
  }
}

</mosaic_0001>

<bundles_post_ra>
// kernel: ms_cam_forward.1
= control target key start
LH: loop header
LB: loop body
LE: loop exit
PB: predicated region body
PF: predicated region fallthrough
CT: control target
= control target key end

     0   :  { %s1210_s30 = smov 0   ;;  %s1459_s0 = inlined_call_operand.vmem [shape: f32[2,64,256], index: 0, kind: input, shape index: {}]   ;;  %s1460_s1 = inlined_call_operand.vmem [shape: bf16[16,64], index: 1, kind: input, shape index: {}]   ;;  %s1461_s2 = inlined_call_operand.vmem [shape: f32[16,1], index: 2, kind: input, shape index: {}]   ;;  %s1462_s3 = inlined_call_operand.vmem [shape: bf16[64,16], index: 3, kind: input, shape index: {}]   ;;  %s1463_s4 = inlined_call_operand.vmem [shape: f32[64,1], index: 4, kind: input, shape index: {}]   ;;  %s1464_s5 = inlined_call_operand.vmem [shape: f32[16,64], index: 5, kind: input, shape index: {}]   ;;  %s1465_s6 = inlined_call_operand.vmem [shape: f32[16,1], index: 6, kind: input, shape index: {}]   ;;  %s1466_s7 = inlined_call_operand.vmem [shape: f32[64,16], index: 7, kind: input, shape index: {}]   ;;  %s1467_s8 = inlined_call_operand.vmem [shape: f32[64,1], index: 8, kind: input, shape index: {}]   ;;  %s1468_s9 = inlined_call_operand.vmem [shape: f32[2,64,256], index: 9, kind: output, shape index: {}]  }
   0x1 LB: > { %s1015_s10 = sadd.s32 4294967295, %s1157_s30   ;;  %p1019_p0 = scmp.ge.s32.totalorder %s1157_s30, 1  ;;  %s1157_s30 = sphi %s1210_s30, %s19_s30  }
   0x2   : > { %p287_p1 = scmp.lt.s32.totalorder %s1157_s30, 3 }
   0x4   : > { %p288_p2 = pnand %p1019_p0, %p287_p1 }
   0x5   : > { %p323_p3 = scmp.lt.s32.totalorder (!%p288_p2), %s1015_s10, 1 }
   0x6   : > { %291 = sbr.rel (%p288_p2) target bundleno = 849 (0x351), region = 56 }
   0xb   : > { %s1470_s10 = smov (!%p323_p3, %s1015_s10), 1  ;;  %v390_v24 = vld [vmem:[%s1464_s5] sm:$0xff]  ;;  %vm394_vm0 = vcmask 523264   ;;  %v391_v41 = vld [vmem:[%s1464_s5 + $0x8] sm:$0xff]  ;;  %vm494_vm1 = vcmask 130048   ;;  %v1159_v43 = vmov 0  }
   0xc   : > { %s1046_s11 = sshll.u32 %s1470_s10, 7  ;;  %1084 = vmatprep.mubr.msk.f32.mxu1 %vm394_vm0, %v390_v24  ;;  %v478_v42 = vld [vmem:[%s1466_s7] sm:$0xff]  ;;  %1112 = vset.pattern.permute.xlu0 %v1159_v43  ;;  %v627_v45 = vld [vmem:[%s1461_s2 + $0x8] sm:$0xff]  ;;  %v480_v57 = vld [vmem:[%s1466_s7 + $0x10] sm:$0xff] }
   0xd   : > { %s327_s14 = scalar_lea.vmem %s1459_s0, %s1046_s11  ;;  %1113 = vset.pattern.permute.xlu1 %v1159_v43  ;;  %823 = vmatprep.mubr.bf16.mxu0 %v1159_v43  ;;  %v626_v44 = vld [vmem:[%s1461_s2] sm:$0xff]  ;;  %v393_v46 = vld [vmem:[%s1465_s6 + $0x8] sm:$0xff]  ;;  %v481_v60 = vld [vmem:[%s1466_s7 + $0x18] sm:$0xff]  ;;  %s1422_s15 = scalar_lea.vmem %s1468_s9, %s1046_s11 }
   0xe   : > { %v1226_v0 = vld [vmem:[%s327_s14 + $0x70] sm:$0xff]  ;;  %v1228_v1 = vld [vmem:[%s327_s14 + $0x78] sm:$0xff]  ;;  %v1230_v2 = vld [vmem:[%s327_s14 + $0x60] sm:$0xff] }
   0xf   : > { %v379_v3 = vadd.f32 %v1228_v1, %v1226_v0  ;;  %v1234_v4 = vld [vmem:[%s327_s14 + $0x68] sm:$0xff]  ;;  %v1236_v5 = vld [vmem:[%s327_s14 + $0x50] sm:$0xff]  ;;  %v1238_v6 = vld [vmem:[%s327_s14 + $0x58] sm:$0xff]  ;;  %v356_v55 = vpack.c.bf16 %v1226_v0, %v1230_v2 }
  0x10   : > { %v373_v7 = vadd.f32 %v1238_v6, %v1236_v5  ;;  %v1242_v8 = vld [vmem:[%s327_s14 + $0x40] sm:$0xff]  ;;  %v1244_v9 = vld [vmem:[%s327_s14 + $0x48] sm:$0xff]  ;;  %v376_v10 = vadd.f32 %v1234_v4, %v1230_v2  ;;  %v1250_v12 = vld [vmem:[%s327_s14 + $0x30] sm:$0xff]  ;;  %v357_v54 = vpack.c.bf16 %v1228_v1, %v1234_v4 }
  0x11   : > { %380 = vadd.xlane.f32.xlu0 %v379_v3  ;;  %v370_v11 = vadd.f32 %v1244_v9, %v1242_v8  ;;  %v1252_v13 = vld [vmem:[%s327_s14 + $0x38] sm:$0xff]  ;;  %v1254_v14 = vld [vmem:[%s327_s14 + $0x20] sm:$0xff]  ;;  %v1256_v15 = vld [vmem:[%s327_s14 + $0x28] sm:$0xff]  ;;  %v355_v58 = vpack.c.bf16 %v1238_v6, %v1244_v9  ;;  %v354_v59 = vpack.c.bf16 %v1236_v5, %v1242_v8 }
  0x12   : > { %374 = vadd.xlane.f32.xlu1 %v373_v7  ;;  %v367_v16 = vadd.f32 %v1252_v13, %v1250_v12  ;;  %v364_v17 = vadd.f32 %v1256_v15, %v1254_v14  ;;  %v1262_v18 = vld [vmem:[%s327_s14 + $0x10] sm:$0xff]  ;;  %v1264_v19 = vld [vmem:[%s327_s14 + $0x18] sm:$0xff]  ;;  %v1266_v20 = vld [vmem:[%s327_s14] sm:$0xff]  ;;  %v353_v62 = vpack.c.bf16 %v1252_v13, %v1256_v15  ;;  %v352_v63 = vpack.c.bf16 %v1250_v12, %v1254_v14 }
  0x13   : > { %v1268_v21 = vld [vmem:[%s327_s14 + $0x8] sm:$0xff]  ;;  %v361_v22 = vadd.f32 %v1264_v19, %v1262_v18  ;;  %v392_v48 = vld [vmem:[%s1465_s6] sm:$0xff]  ;;  %v484_v7 = vld [vmem:[%s1466_s7 + $0x30] sm:$0xff] }
  0x14   : > { %v358_v23 = vadd.f32 %v1268_v21, %v1266_v20  ;;  %v479_v56 = vld [vmem:[%s1466_s7 + $0x8] sm:$0xff]  ;;  %v482_v61 = vld [vmem:[%s1466_s7 + $0x20] sm:$0xff] }
  0x15   : > { %377 = vadd.xlane.f32.xlu0 %v376_v10  ;;  %v483_v3 = vld [vmem:[%s1466_s7 + $0x28] sm:$0xff]  ;;  %v351_v10 = vpack.c.bf16 %v1264_v19, %v1268_v21 }
  0x16   : > { %371 = vadd.xlane.f32.xlu1 %v370_v11  ;;  %v350_v11 = vpack.c.bf16 %v1262_v18, %v1266_v20  ;;  %v704_v24 = vld [vmem:[%s1463_s4 + $0x8] sm:$0xff] }
  0x19   : > { %368 = vadd.xlane.f32.xlu0 %v367_v16  ;;  %v485_v16 = vld [vmem:[%s1466_s7 + $0x38] sm:$0xff] }
  0x1a   : > { %365 = vadd.xlane.f32.xlu1 %v364_v17  ;;  %v1114_v17 = vld [vmem:[%s1460_s1] sm:$0xff]  }
  0x1d   : > { %362 = vadd.xlane.f32.xlu0 %v361_v22  ;;  %v487_v22 = vld [vmem:[%s1467_s8 + $0x8] sm:$0xff] }
  0x1e   : > { %359 = vadd.xlane.f32.xlu1 %v358_v23 }
  0x2f   : > { %635 = vperm.xlu1 %1113, %v627_v45   ;;  %v491_v45 = vld [vmem:[%s1467_s8 + $0x28] sm:$0xff] }
  0x33   : > { %630 = vperm.xlu0 %1112, %v626_v44   ;;  %v705_v44 = vld [vmem:[%s1463_s4 + $0x10] sm:$0xff] }
  0x9a   : > { %v381_v25 = vpop.xlane.xlu0 %380 }
  0x9b   : > { %v389_v26 = vmul.f32 0.00390625, %v381_v25  ;;  %v375_v27 = vpop.xlane.xlu1 %374  ;;  %v486_v25 = vld [vmem:[%s1467_s8] sm:$0xff] }
  0x9c   : > { %v387_v31 = vmul.f32 0.00390625, %v375_v27 }
  0x9d   : > { %1068 = vmatprep.subr.mxu1 %v389_v26 }
  0x9e   : > { %1069 = vmatpush3.msra.mxu1 %v389_v26  ;;  %v378_v28 = vpop.xlane.xlu0 %377 }
  0x9f   : > { %v388_v29 = vmul.f32 0.00390625, %v378_v28  ;;  %v372_v30 = vpop.xlane.xlu1 %371 }
  0xa0   : > { %v386_v32 = vmul.f32 0.00390625, %v372_v30  ;;  %v703_v30 = vld [vmem:[%s1463_s4] sm:$0xff] }
  0xa1   : > { %1070 = vmatprep.subr.mxu1 %v388_v29 }
  0xa2   : > { %1071 = vmatpush3.msra.mxu1 %v388_v29  ;;  %v369_v33 = vpop.xlane.xlu0 %368 }
  0xa3   : > { %1072 = vmatprep.subr.mxu1 %v387_v31  ;;  %v385_v34 = vmul.f32 0.00390625, %v369_v33  ;;  %v366_v35 = vpop.xlane.xlu1 %365 }
  0xa4   : > { %1073 = vmatpush3.msra.mxu1 %v387_v31  ;;  %v384_v36 = vmul.f32 0.00390625, %v366_v35  ;;  %v489_v31 = vld [vmem:[%s1467_s8 + $0x18] sm:$0xff] }
  0xa5   : > { %1074 = vmatprep.subr.mxu1 %v386_v32 }
  0xa6   : > { %1075 = vmatpush3.msra.mxu1 %v386_v32  ;;  %v363_v37 = vpop.xlane.xlu0 %362 }
  0xa7   : > { %1076 = vmatprep.subr.mxu1 %v385_v34  ;;  %v383_v38 = vmul.f32 0.00390625, %v363_v37  ;;  %v360_v39 = vpop.xlane.xlu1 %359  ;;  %v488_v37 = vld [vmem:[%s1467_s8 + $0x10] sm:$0xff] }
  0xa8   : > { %1077 = vmatpush3.msra.mxu1 %v385_v34  ;;  %v382_v40 = vmul.f32 0.00390625, %v360_v39 }
  0xa9   : > { %1078 = vmatprep.subr.mxu1 %v384_v36 }
  0xaa   : > { %1079 = vmatpush3.msra.mxu1 %v384_v36  ;;  %v706_v36 = vld [vmem:[%s1463_s4 + $0x18] sm:$0xff] }
  0xab   : > { %1080 = vmatprep.subr.mxu1 %v383_v38 }
  0xac   : > { %1081 = vmatpush3.msra.mxu1 %v383_v38 }
  0xad   : > { %1082 = vmatprep.subr.mxu1 %v382_v40 }
  0xae   : > { %1083 = vmatpush3.msra.mxu1 %v382_v40  ;;  %v493_v40 = vld [vmem:[%s1467_s8 + $0x38] sm:$0xff] }
  0xaf   : > { %1085 = vmatmul.mubr.msk.f32.vlgmr.msra.gmra.mxu1 %vm394_vm0, %v391_v41 }
  0xb0   : > { %1091 = vmatprep.mubr.msk.f32.mxu1 %vm494_vm1, %v478_v42 }
 0x16f   : > { %v1086_v47 = vpop.f32.mrf.mxu1 }
 0x170   : > { %v473_v49 = vadd.f32 %v1086_v47, %v393_v46  ;;  %v710_v47 = vld [vmem:[%s1463_s4 + $0x38] sm:$0xff] }
 0x171   : > { %v467_v50 = vpop.f32.mrf.mxu1 }
 0x172   : > { %v477_v51 = vmax.f32 %v473_v49, 0.0  ;;  %v468_v52 = vadd.f32 %v467_v50, %v392_v48 }
 0x174   : > { %v476_v53 = vmax.f32 %v468_v52, 0.0  ;;  %1087 = vmatprep.subr.mxu1 %v477_v51 }
 0x175   : > { %1088 = vmatpush3.msra.mxu1 %v477_v51 }
 0x176   : > { %1089 = vmatprep.subr.mxu1 %v476_v53 }
 0x177   : > { %1090 = vmatpush3.msra.mxu1 %v476_v53  ;;  %v708_v53 = vld [vmem:[%s1463_s4 + $0x28] sm:$0xff] }
 0x178   : > { %1092 = vmatmul.mubr.msk.f32.vlgmr.msra.gmra.mxu1 %vm494_vm1, %v479_v56  ;;  %654 = vmatprep.subr.bf16.mxu1 %v357_v54  ;;  %v490_v54 = vld [vmem:[%s1467_s8 + $0x20] sm:$0xff] }
 0x179   : > { %655 = vmatpush1.bf16.msra.mxu1 %v356_v55  ;;  %1094 = vmatprep.mubr.msk.f32.mxu1 %vm494_vm1, %v480_v57  ;;  %v636_v57 = vpop.permute.xlu1 %635 }
 0x17a   : > { %656 = vmatprep.subr.bf16.mxu1 %v355_v58 }
 0x17c   : > { %1095 = vmatmul.mubr.msk.f32.gmra.mxu1 %vm494_vm1, %v481_v60  ;;  %v631_v60 = vpop.permute.xlu0 %630 }
 0x17d   : > { %657 = vmatpush1.bf16.msra.mxu1 %v354_v59  ;;  %1097 = vmatprep.mubr.msk.f32.mxu1 %vm494_vm1, %v482_v61  ;;  %v707_v61 = vld [vmem:[%s1463_s4 + $0x20] sm:$0xff] }
 0x17e   : > { %658 = vmatprep.subr.bf16.mxu1 %v353_v62  ;;  %v492_v62 = vld [vmem:[%s1467_s8 + $0x30] sm:$0xff] }
 0x180   : > { %1098 = vmatmul.mubr.msk.f32.gmra.mxu1 %vm494_vm1, %v483_v3 }
 0x181   : > { %659 = vmatpush1.bf16.msra.mxu1 %v352_v63  ;;  %1100 = vmatprep.mubr.msk.f32.mxu1 %vm494_vm1, %v484_v7 }
 0x182   : > { %660 = vmatprep.subr.bf16.mxu1 %v351_v10 }
 0x184   : > { %1101 = vmatmul.mubr.msk.f32.gmra.mxu1 %vm494_vm1, %v485_v16 }
 0x185   : > { %661 = vmatpush1.bf16.msra.mxu1 %v350_v11  ;;  %678 = vmatprep.mubr.bf16.mxu1 %v1159_v43 }
 0x188   : > { %1035 = vmatmul.mubr.msk.bf16.vlgmr.msra.gmra.mxu1 %vm394_vm0, %v1114_v17 }
 0x238   : > { %v1093_v23 = vpop.f32.mrf.mxu1 }
 0x239   : > { %v591_v26 = vadd.f32 %v1093_v23, %v487_v22  ;;  %v709_v23 = vld [vmem:[%s1463_s4 + $0x30] sm:$0xff] }
 0x23a   : > { %v585_v27 = vpop.f32.mrf.mxu1 }
 0x23b   : > { %v712_v28 = vadd.f32 %v704_v24, %v591_v26  ;;  %v586_v29 = vadd.f32 %v585_v27, %v486_v25 }
 0x23c   : > { %v1096_v32 = vpop.f32.mrf.mxu1 }
 0x23d   : > { %726 = vperm.xlu1 %1113, %v712_v28   ;;  %v711_v34 = vadd.f32 %v703_v30, %v586_v29  ;;  %v601_v35 = vadd.f32 %v1096_v32, %v489_v31  ;;  %v1115_v31 = vld [vmem:[%s1462_s3] sm:$0xff]   ;;  %v1116_v32 = vld [vmem:[%s1462_s3 + $0x8] sm:$0xff]  }
 0x23e   : > { %v595_v33 = vpop.f32.mrf.mxu1 }
 0x23f   : > { %v714_v41 = vadd.f32 %v706_v36, %v601_v35  ;;  %v596_v42 = vadd.f32 %v595_v33, %v488_v37  ;;  %v1117_v33 = vld [vmem:[%s1462_s3 + $0x10] sm:$0xff]  }
 0x240   : > { %v1099_v38 = vpop.f32.mrf.mxu1 }
 0x241   : > { %721 = vperm.xlu1 %1113, %v711_v34   ;;  %v713_v50 = vadd.f32 %v705_v44, %v596_v42  ;;  %v611_v51 = vadd.f32 %v1099_v38, %v491_v45  ;;  %v1118_v34 = vld [vmem:[%s1462_s3 + $0x18] sm:$0xff]  }
 0x242   : > { %v605_v39 = vpop.f32.mrf.mxu1 }
 0x243   : > { %v716_v58 = vadd.f32 %v708_v53, %v611_v51  ;;  %v606_v59 = vadd.f32 %v605_v39, %v490_v54 }
 0x244   : > { %v1102_v46 = vpop.f32.mrf.mxu1 }
 0x245   : > { %v621_v48 = vadd.f32 %v1102_v46, %v493_v40  ;;  %736 = vperm.xlu1 %1113, %v714_v41   ;;  %v715_v16 = vadd.f32 %v707_v61, %v606_v59 }
 0x246   : > { %v615_v49 = vpop.f32.mrf.mxu1 }
 0x247   : > { %v718_v52 = vadd.f32 %v710_v47, %v621_v48  ;;  %v616_v17 = vadd.f32 %v615_v49, %v492_v62 }
 0x248   : > { %v680_v55 = vpop.f32.mrf.mxu1 }
 0x249   : > { %756 = vperm.xlu0 %1112, %v718_v52   ;;  %731 = vperm.xlu1 %1113, %v713_v50   ;;  %v681_v10 = vadd.f32 %v680_v55, %v631_v60  ;;  %v717_v28 = vadd.f32 %v709_v23, %v616_v17 }
 0x24a   : > { %v682_v56 = vpop.f32.mrf.mxu1 }
 0x24b   : > { %v683_v3 = vadd.f32 %v682_v56, %v631_v60  ;;  %v689_v27 = vmax.f32 %v681_v10, 0.0 }
 0x24c   : > { %v684_v63 = vpop.f32.mrf.mxu1 }
 0x24d   : > { %v685_v7 = vadd.f32 %v684_v63, %v636_v57  ;;  %746 = vperm.xlu1 %1113, %v716_v58   ;;  %v690_v25 = vmax.f32 %v683_v3, 0.0 }
 0x24e   : > { %v686_v11 = vpop.f32.mrf.mxu1 }
 0x24f   : > { %v687_v22 = vadd.f32 %v686_v11, %v636_v57  ;;  %v691_v24 = vmax.f32 %v685_v7, 0.0 }
 0x251   : > { %v692_v26 = vmax.f32 %v687_v22, 0.0  ;;  %741 = vperm.xlu1 %1113, %v715_v16   ;;  %v701_v30 = vpack.c.bf16 %v691_v24, %v689_v27 }
 0x253   : > { %v702_v29 = vpack.c.bf16 %v692_v26, %v690_v25 }
 0x255   : > { %751 = vperm.xlu1 %1113, %v717_v28   ;;  %805 = vmatprep.subr.bf16.mxu0 %v702_v29 }
 0x256   : > { %806 = vmatpush1.bf16.msra.mxu0 %v701_v30 }
 0x259   : > { %1040 = vmatmul.mubr.msk.bf16.vlgmr.msra.gmra.mxu0 %vm494_vm1, %v1115_v31 }
 0x25a   : > { %833 = vmatprep.mubr.bf16.mxu0 %v1159_v43 }
 0x261   : > { %1041 = vmatmul.mubr.msk.bf16.gmra.mxu0 %vm494_vm1, %v1116_v32 }
 0x262   : > { %843 = vmatprep.mubr.bf16.mxu0 %v1159_v43 }
 0x269   : > { %1042 = vmatmul.mubr.msk.bf16.gmra.mxu0 %vm494_vm1, %v1117_v33 }
 0x26a   : > { %853 = vmatprep.mubr.bf16.mxu0 %v1159_v43 }
 0x271   : > { %1043 = vmatmul.mubr.msk.bf16.gmra.mxu0 %vm494_vm1, %v1118_v34 }
 0x2b8   : > { %v727_v35 = vpop.permute.xlu1 %726 }
 0x2bc   : > { %v722_v36 = vpop.permute.xlu1 %721 }
 0x2c0   : > { %v737_v37 = vpop.permute.xlu1 %736 }
 0x2c4   : > { %v732_v44 = vpop.permute.xlu1 %731 }
 0x2c8   : > { %v747_v53 = vpop.permute.xlu1 %746 }
 0x2cc   : > { %v742_v63 = vpop.permute.xlu1 %741 }
 0x319   : > { %v825_v38 = vpop.f32.mrf.mxu0 }
 0x31a   : > { %v826_v39 = vadd.f32 %v825_v38, %v722_v36 }
 0x31b   : > { %v827_v40 = vpop.f32.mrf.mxu0 }
 0x31c   : > { %v864_v41 = vmul.f32 0.5, %v826_v39  ;;  %v828_v42 = vadd.f32 %v827_v40, %v722_v36  ;;  %v752_v36 = vpop.permute.xlu1 %751 }
 0x31d   : > { %v829_v45 = vpop.f32.mrf.mxu0 }
 0x31e   : > { %1119 = vtanh.f32 %v864_v41  ;;  %v865_v46 = vmul.f32 0.5, %v828_v42  ;;  %v830_v47 = vadd.f32 %v829_v45, %v727_v35 }
 0x31f   : > { %v831_v43 = vpop.f32.mrf.mxu0 }
 0x320   : > { %1121 = vtanh.f32 %v865_v46  ;;  %v866_v48 = vmul.f32 0.5, %v830_v47  ;;  %v832_v49 = vadd.f32 %v831_v43, %v727_v35 }
 0x321   : > { %v835_v50 = vpop.f32.mrf.mxu0 }
 0x322   : > { %1123 = vtanh.f32 %v866_v48  ;;  %v867_v51 = vmul.f32 0.5, %v832_v49  ;;  %v836_v52 = vadd.f32 %v835_v50, %v732_v44 }
 0x323   : > { %v837_v54 = vpop.f32.mrf.mxu0 }
 0x324   : > { %1125 = vtanh.f32 %v867_v51  ;;  %v868_v55 = vmul.f32 0.5, %v836_v52  ;;  %v838_v56 = vadd.f32 %v837_v54, %v732_v44 }
 0x325   : > { %v839_v57 = vpop.f32.mrf.mxu0 }
 0x326   : > { %1127 = vtanh.f32 %v868_v55  ;;  %v869_v58 = vmul.f32 0.5, %v838_v56  ;;  %v840_v59 = vadd.f32 %v839_v57, %v737_v37 }
 0x327   : > { %v841_v60 = vpop.f32.mrf.mxu0 }
 0x328   : > { %1129 = vtanh.f32 %v869_v58  ;;  %v870_v61 = vmul.f32 0.5, %v840_v59  ;;  %v842_v62 = vadd.f32 %v841_v60, %v737_v37 }
 0x329   : > { %v845_v3 = vpop.f32.mrf.mxu0 }
 0x32a   : > { %1131 = vtanh.f32 %v870_v61  ;;  %v871_v7 = vmul.f32 0.5, %v842_v62  ;;  %v846_v10 = vadd.f32 %v845_v3, %v742_v63 }
 0x32b   : > { %v1120_v11 = vpop.eup %1119  ;;  %v847_v16 = vpop.f32.mrf.mxu0 }
 0x32c   : > { %v896_v17 = vmul.f32 0.5, %v1120_v11  ;;  %1133 = vtanh.f32 %v871_v7  ;;  %v872_v22 = vmul.f32 0.5, %v846_v10  ;;  %v848_v23 = vadd.f32 %v847_v16, %v742_v63 }
 0x32d   : > { %v1122_v24 = vpop.eup %1121  ;;  %v849_v25 = vpop.f32.mrf.mxu0 }
 0x32e   : > { %v912_v26 = vadd.f32 0.5, %v896_v17  ;;  %v897_v27 = vmul.f32 0.5, %v1122_v24  ;;  %1135 = vtanh.f32 %v872_v22  ;;  %v873_v28 = vmul.f32 0.5, %v848_v23 }
 0x32f   : > { %v1124_v29 = vpop.eup %1123  ;;  %v850_v30 = vadd.f32 %v849_v25, %v747_v53  ;;  %v851_v31 = vpop.f32.mrf.mxu0 }
 0x330   : > { %v928_v32 = vmul.f32 %v912_v26, %v1266_v20  ;;  %v913_v33 = vadd.f32 0.5, %v897_v27  ;;  %v898_v34 = vmul.f32 0.5, %v1124_v29  ;;  %1137 = vtanh.f32 %v873_v28 }
 0x331   : > { %v1126_v35 = vpop.eup %1125  ;;  %v874_v37 = vmul.f32 0.5, %v850_v30  ;;  %v852_v38 = vadd.f32 %v851_v31, %v747_v53  ;;  %v855_v39 = vpop.f32.mrf.mxu0 }
 0x332   : > { %944 = vst [vmem:[%s1422_s15] sm:$0xff] %v928_v32  ;;  %v929_v40 = vmul.f32 %v913_v33, %v1268_v21  ;;  %v914_v41 = vadd.f32 0.5, %v898_v34  ;;  %v899_v42 = vmul.f32 0.5, %v1126_v35  ;;  %v856_v44 = vadd.f32 %v855_v39, %v752_v36  ;;  %v757_v21 = vpop.permute.xlu0 %756 }
 0x333   : > { %v1128_v45 = vpop.eup %1127  ;;  %1139 = vtanh.f32 %v874_v37  ;;  %v875_v46 = vmul.f32 0.5, %v852_v38  ;;  %v857_v20 = vpop.f32.mrf.mxu0 }
 0x334   : > { %945 = vst [vmem:[%s1422_s15 + $0x8] sm:$0xff] %v929_v40  ;;  %v930_v47 = vmul.f32 %v914_v41, %v1262_v18  ;;  %v915_v43 = vadd.f32 0.5, %v899_v42  ;;  %v900_v48 = vmul.f32 0.5, %v1128_v45  ;;  %v876_v49 = vmul.f32 0.5, %v856_v44 }
 0x335   : > { %v1130_v50 = vpop.eup %1129  ;;  %1141 = vtanh.f32 %v875_v46  ;;  %v858_v51 = vadd.f32 %v857_v20, %v752_v36  ;;  %v859_v52 = vpop.f32.mrf.mxu0 }
 0x336   : > { %946 = vst [vmem:[%s1422_s15 + $0x10] sm:$0xff] %v930_v47  ;;  %v931_v53 = vmul.f32 %v915_v43, %v1264_v19  ;;  %v916_v54 = vadd.f32 0.5, %v900_v48  ;;  %v901_v55 = vmul.f32 0.5, %v1130_v50  ;;  %1143 = vtanh.f32 %v876_v49 }
 0x337   : > { %v1132_v56 = vpop.eup %1131  ;;  %v877_v57 = vmul.f32 0.5, %v858_v51  ;;  %v860_v58 = vadd.f32 %v859_v52, %v757_v21  ;;  %v861_v18 = vpop.f32.mrf.mxu0 }
 0x338   : > { %947 = vst [vmem:[%s1422_s15 + $0x18] sm:$0xff] %v931_v53  ;;  %v932_v59 = vmul.f32 %v916_v54, %v1254_v14  ;;  %v917_v60 = vadd.f32 0.5, %v901_v55  ;;  %v902_v61 = vmul.f32 0.5, %v1132_v56  ;;  %v862_v62 = vadd.f32 %v861_v18, %v757_v21 }
 0x339   : > { %v1134_v63 = vpop.eup %1133  ;;  %1145 = vtanh.f32 %v877_v57  ;;  %v878_v3 = vmul.f32 0.5, %v860_v58 }
 0x33a   : > { %948 = vst [vmem:[%s1422_s15 + $0x20] sm:$0xff] %v932_v59  ;;  %v933_v19 = vmul.f32 %v917_v60, %v1256_v15  ;;  %v918_v7 = vadd.f32 0.5, %v902_v61  ;;  %v903_v10 = vmul.f32 0.5, %v1134_v63  ;;  %v879_v11 = vmul.f32 0.5, %v862_v62 }
 0x33b   : > { %v1136_v16 = vpop.eup %1135  ;;  %1147 = vtanh.f32 %v878_v3 }
 0x33c   : > { %949 = vst [vmem:[%s1422_s15 + $0x28] sm:$0xff] %v933_v19  ;;  %v934_v14 = vmul.f32 %v918_v7, %v1250_v12  ;;  %v919_v17 = vadd.f32 0.5, %v903_v10  ;;  %v904_v22 = vmul.f32 0.5, %v1136_v16  ;;  %1149 = vtanh.f32 %v879_v11 }
 0x33d   : > { %v1138_v23 = vpop.eup %1137 }
 0x33e   : > { %950 = vst [vmem:[%s1422_s15 + $0x30] sm:$0xff] %v934_v14  ;;  %v935_v24 = vmul.f32 %v919_v17, %v1252_v13  ;;  %v920_v25 = vadd.f32 0.5, %v904_v22  ;;  %v905_v15 = vmul.f32 0.5, %v1138_v23 }
 0x340   : > { %v1140_v26 = vpop.eup %1139  ;;  %951 = vst [vmem:[%s1422_s15 + $0x38] sm:$0xff] %v935_v24  ;;  %v936_v27 = vmul.f32 %v920_v25, %v1242_v8  ;;  %v921_v28 = vadd.f32 0.5, %v905_v15 }
 0x341   : > { %v906_v29 = vmul.f32 0.5, %v1140_v26 }
 0x342   : > { %v1142_v30 = vpop.eup %1141  ;;  %952 = vst [vmem:[%s1422_s15 + $0x40] sm:$0xff] %v936_v27  ;;  %v937_v12 = vmul.f32 %v921_v28, %v1244_v9 }
 0x343   : > { %v1144_v31 = vpop.eup %1143  ;;  %v922_v32 = vadd.f32 0.5, %v906_v29  ;;  %v907_v33 = vmul.f32 0.5, %v1142_v30 }
 0x344   : > { %953 = vst [vmem:[%s1422_s15 + $0x48] sm:$0xff] %v937_v12  ;;  %v908_v13 = vmul.f32 0.5, %v1144_v31 }
 0x345   : > { %v938_v34 = vmul.f32 %v922_v32, %v1236_v5  ;;  %v923_v35 = vadd.f32 0.5, %v907_v33 }
 0x346   : > { %v1146_v36 = vpop.eup %1145  ;;  %v924_v37 = vadd.f32 0.5, %v908_v13 }
 0x347   : > { %954 = vst [vmem:[%s1422_s15 + $0x50] sm:$0xff] %v938_v34  ;;  %v939_v8 = vmul.f32 %v923_v35, %v1238_v6  ;;  %v909_v38 = vmul.f32 0.5, %v1146_v36 }
 0x348   : > { %v1148_v9 = vpop.eup %1147  ;;  %v940_v39 = vmul.f32 %v924_v37, %v1230_v2 }
 0x349   : > { %v1150_v40 = vpop.eup %1149  ;;  %955 = vst [vmem:[%s1422_s15 + $0x58] sm:$0xff] %v939_v8  ;;  %v925_v41 = vadd.f32 0.5, %v909_v38  ;;  %v910_v42 = vmul.f32 0.5, %v1148_v9 }
 0x34a   : > { %956 = vst [vmem:[%s1422_s15 + $0x60] sm:$0xff] %v940_v39  ;;  %v911_v44 = vmul.f32 0.5, %v1150_v40 }
 0x34b   : > { %v941_v5 = vmul.f32 %v925_v41, %v1234_v4  ;;  %v926_v45 = vadd.f32 0.5, %v910_v42 }
 0x34c   : > { %v927_v46 = vadd.f32 0.5, %v911_v44 }
 0x34d   : > { %957 = vst [vmem:[%s1422_s15 + $0x68] sm:$0xff] %v941_v5  ;;  %v942_v20 = vmul.f32 %v926_v45, %v1226_v0 }
 0x34e   : > { %v943_v6 = vmul.f32 %v927_v46, %v1228_v1 }
 0x34f   : > { %958 = vst [vmem:[%s1422_s15 + $0x70] sm:$0xff] %v942_v20 }
 0x350   : > { %959 = vst [vmem:[%s1422_s15 + $0x78] sm:$0xff] %v943_v6 }
 0x351 PF: > { %s19_s30 = sadd.s32 1, %s1157_s30  }
 0x352   : > { %p16_p4 = scmp.ge.s32.totalorder %s19_s30, 4  }
 0x354   :  { %18 = sbr.rel (!%p16_p4) target bundleno = 1 (0x1), region = 86 }

</bundles_post_ra>
